<compile_context>
chip_gen: v7x
topology: tpu7x:2x2x1
jax: 0.10.0
libtpu: 0.0.40
codegen_flags: <defaults>
</compile_context>

<pallas_src>
import functools

import jax
import jax.numpy as jnp
from jax.experimental import pallas as pl
from jax.experimental.pallas import tpu as pltpu


# ---------------------------------------------------------------------------
# helpers
# ---------------------------------------------------------------------------
def _round_up(a: int, b: int) -> int:
    return (a + b - 1) // b * b


def _vmem_limit(*buf_bytes: int) -> int:
    # double-buffered operands + headroom, clamped <= 48 MiB (v7x-safe).
    need = 2 * sum(buf_bytes) + (2 << 20)
    return int(min(max(need, 32 << 20), 48 << 20))


# ---------------------------------------------------------------------------
# Kernel A: conv4x4 as matmul + per-tile per-channel partial stats
#   y = wT @ pT (f32 acc, bf16 stash); partial sum / sumsq reduced to 128
#   lanes with VPU adds (no cross-lane XLU reduce in-kernel).
# ---------------------------------------------------------------------------
def _conv_stats_kernel(pT_ref, wT_ref, y_ref, psum_ref, psq_ref, *, n_chunks):
    # pT_ref: (K, TM) bf16   wT_ref: (C_out, K) bf16
    # y_ref: (C_out, TM) bf16   psum/psq: (C_out, 128) f32 per tile
    y = jnp.dot(wT_ref[...], pT_ref[...], preferred_element_type=jnp.float32)
    y_ref[...] = y.astype(y_ref.dtype)
    c = y[:, 0:128]
    s = c
    q = c * c
    for k in range(1, n_chunks):            # static unroll: VPU adds only
        c = y[:, k * 128:(k + 1) * 128]
        s = s + c
        q = q + c * c
    psum_ref[...] = s
    psq_ref[...] = q


def _conv_stats(pT, wT, tm):
    K, M_pad = pT.shape
    C_out = wT.shape[0]
    n_t = M_pad // tm
    kernel = functools.partial(_conv_stats_kernel, n_chunks=tm // 128)
    return pl.pallas_call(
        kernel,
        out_shape=(
            jax.ShapeDtypeStruct((C_out, M_pad), jnp.bfloat16),
            jax.ShapeDtypeStruct((C_out, n_t * 128), jnp.float32),
            jax.ShapeDtypeStruct((C_out, n_t * 128), jnp.float32),
        ),
        grid=(n_t,),
        in_specs=[
            pl.BlockSpec((K, tm), lambda t: (0, t)),
            pl.BlockSpec((C_out, K), lambda t: (0, 0)),
        ],
        out_specs=(
            pl.BlockSpec((C_out, tm), lambda t: (0, t)),
            pl.BlockSpec((C_out, 128), lambda t: (0, t)),
            pl.BlockSpec((C_out, 128), lambda t: (0, t)),
        ),
        compiler_params=pltpu.CompilerParams(
            dimension_semantics=("parallel",),
            vmem_limit_bytes=_vmem_limit(
                K * tm * 2, C_out * K * 2, C_out * tm * 2, C_out * 128 * 8),
        ),
    )(pT, wT)


# ---------------------------------------------------------------------------
# Kernel B: BatchNorm apply (precomputed scale/shift) + LeakyReLU(0.2),
#   in-place over y (input_output_aliases), fully parallel m-tile grid.
# ---------------------------------------------------------------------------
def _bn_lrelu_kernel(y_ref, scale_ref, shift_ref, o_ref, *, slope):
    z = y_ref[...].astype(jnp.float32) * scale_ref[...] + shift_ref[...]
    o_ref[...] = jnp.where(z >= 0, z, slope * z).astype(o_ref.dtype)


def _bn_lrelu(y, scale, shift, tm):
    C_out, M_pad = y.shape
    n_t = M_pad // tm
    kernel = functools.partial(_bn_lrelu_kernel, slope=0.2)
    return pl.pallas_call(
        kernel,
        out_shape=jax.ShapeDtypeStruct((C_out, M_pad), jnp.bfloat16),
        grid=(n_t,),
        in_specs=[
            pl.BlockSpec((C_out, tm), lambda t: (0, t)),
            pl.BlockSpec((C_out, 1), lambda t: (0, 0)),
            pl.BlockSpec((C_out, 1), lambda t: (0, 0)),
        ],
        out_specs=pl.BlockSpec((C_out, tm), lambda t: (0, t)),
        input_output_aliases={0: 0},   # overwrite y in place
        compiler_params=pltpu.CompilerParams(
            dimension_semantics=("parallel",),
            vmem_limit_bytes=_vmem_limit(C_out * tm * 2, C_out * tm * 2),
        ),
    )(y, scale, shift)


# ---------------------------------------------------------------------------
# Kernel C: last block = conv4x4 + bias + sigmoid (C_out == 1), lane-dense
# ---------------------------------------------------------------------------
def _conv_bias_sigmoid_kernel(pT_ref, wT_ref, b_ref, o_ref):
    y = jnp.dot(wT_ref[...], pT_ref[...], preferred_element_type=jnp.float32)
    o_ref[...] = jax.nn.sigmoid(y + b_ref[...])   # sigmoid -> EUP slot


def _conv_sigmoid(pT, wT, bias, tm):
    K, M_pad = pT.shape
    C_out = wT.shape[0]
    n_t = M_pad // tm
    return pl.pallas_call(
        _conv_bias_sigmoid_kernel,
        out_shape=jax.ShapeDtypeStruct((C_out, M_pad), jnp.float32),
        grid=(n_t,),
        in_specs=[
            pl.BlockSpec((K, tm), lambda t: (0, t)),
            pl.BlockSpec((C_out, K), lambda t: (0, 0)),
            pl.BlockSpec((C_out, 1), lambda t: (0, 0)),
        ],
        out_specs=pl.BlockSpec((C_out, tm), lambda t: (0, t)),
        compiler_params=pltpu.CompilerParams(
            dimension_semantics=("parallel",),
            vmem_limit_bytes=_vmem_limit(K * tm * 2, C_out * K * 2, C_out * tm * 4),
        ),
    )(pT, wT, bias)


# ---------------------------------------------------------------------------
# Layout plumbing (plain JAX): channels-major im2col -> (K, M_pad) bf16.
# Uses 16 strided slices (no gather); final 1x1-output block is a reshape.
# ---------------------------------------------------------------------------
def _im2col_T(a_cnhw, stride, padding, oh, ow, m_pad):
    """a_cnhw: (C, N, H, W) -> transposed patches (C*16, m_pad); K = (ci, kh, kw)."""
    C, N, H, W = a_cnhw.shape
    m = N * oh * ow
    if stride == 1 and padding == 0 and oh == 1 and ow == 1:
        # 4x4 input, 4x4 kernel: im2col is a pure transpose/reshape.
        pT = jnp.transpose(a_cnhw, (0, 2, 3, 1)).reshape(C * 16, N)
    else:
        xp = jnp.pad(a_cnhw,
                     ((0, 0), (0, 0), (padding, padding), (padding, padding)))
        taps = []
        for kh in range(4):
            for kw in range(4):
                t = jax.lax.slice(
                    xp, (0, 0, kh, kw),
                    (C, N, kh + (oh - 1) * stride + 1, kw + (ow - 1) * stride + 1),
                    (1, 1, stride, stride))
                taps.append(t.reshape(C, 1, m))
        pT = jnp.concatenate(taps, axis=1).reshape(C * 16, m)
    if m_pad > m:
        pT = jnp.pad(pT, ((0, 0), (0, m_pad - m)))
    return pT


# ---------------------------------------------------------------------------
# Discriminator forward (stack of blocks)
# ---------------------------------------------------------------------------
@functools.partial(jax.jit, static_argnames=("config",))
def discriminator_forward(x, params, config):
    """x: (N, C, H, W) NCHW float32 -> DCGAN discriminator output, NCHW float32."""
    N = x.shape[0]
    a = jnp.transpose(x, (1, 0, 2, 3)).astype(jnp.bfloat16)   # channels-major (C,N,H,W)
    for (w, b, g, be), (stride, padding, is_last) in zip(params, config):
        C_out, C_in = w.shape[0], w.shape[1]
        H, W = a.shape[2], a.shape[3]
        OH = (H + 2 * padding - 4) // stride + 1
        OW = (W + 2 * padding - 4) // stride + 1
        M = N * OH * OW
        TM = min(1024, _round_up(M, 128))
        M_pad = _round_up(M, TM)

        pT = _im2col_T(a, stride, padding, OH, OW, M_pad)       # (K, M_pad) bf16
        wT = w.reshape(C_out, C_in * 16).astype(jnp.bfloat16)   # (C_out, K)  bf16

        if is_last:
            y = _conv_sigmoid(pT, wT, b.reshape(C_out, 1).astype(jnp.float32), TM)
            a = y[:, :M].reshape(C_out, N, OH, OW)
        else:
            # conv bias folds into the BN batch mean -> dropped (exact no-op)
            y, psum, psq = _conv_stats(pT, wT, TM)
            s = jnp.sum(psum, axis=1)                           # (C_out,) f32
            q = jnp.sum(psq, axis=1)
            mean = s / M
            var = jnp.maximum(q / M - mean * mean, 0.0)         # biased var
            scale = g.astype(jnp.float32) * jax.lax.rsqrt(var + 1e-5)
            shift = be.astype(jnp.float32) - mean * scale
            yact = _bn_lrelu(y, scale.reshape(C_out, 1), shift.reshape(C_out, 1), TM)
            a = yact[:, :M].reshape(C_out, N, OH, OW)           # stays channels-major
    return jnp.transpose(a, (1, 0, 2, 3)).astype(jnp.float32)   # back to NCHW


# ---------------------------------------------------------------------------
# Parameter construction mirroring the PyTorch Discriminator.__init__
# ---------------------------------------------------------------------------
def make_discriminator_params(key, in_channels=3, base_width=64, num_layers=5):
    cfgs = [(in_channels, base_width, 2, 1, False)]
    for i in range(num_layers - 1):
        is_last = i == num_layers - 2
        cin = base_width * 2 ** i
        cout = 1 if is_last else base_width * 2 ** (i + 1)
        stride = 1 if is_last else 2
        padding = 0 if is_last else 1
        cfgs.append((cin, cout, stride, padding, is_last))

    params = []
    for (cin, cout, _, _, _) in cfgs:
        key, kw, kb = jax.random.split(key, 3)
        w = 0.05 * jax.random.normal(kw, (cout, cin, 4, 4), jnp.float32)
        b = 0.05 * jax.random.normal(kb, (cout,), jnp.float32)
        g = jnp.ones((cout,), jnp.float32)    # BatchNorm2d default init
        be = jnp.zeros((cout,), jnp.float32)
        params.append((w, b, g, be))
    config = tuple((s, p, last) for (_, _, s, p, last) in cfgs)
    return tuple(params), config


# ---------------------------------------------------------------------------
# Pure-JAX f32 reference (PyTorch semantics) for correctness check
# ---------------------------------------------------------------------------
def _reference_forward(x, params, config):
    a = x.astype(jnp.float32)
    for (w, b, g, be), (stride, padding, is_last) in zip(params, config):
        y = jax.lax.conv_general_dilated(
            a, w.astype(jnp.float32), (stride, stride),
            ((padding, padding), (padding, padding)),
            dimension_numbers=("NCHW", "OIHW", "NCHW"),
        ) + b.reshape(1, -1, 1, 1)
        if is_last:
            a = jax.nn.sigmoid(y)
        else:
            mean = jnp.mean(y, axis=(0, 2, 3), keepdims=True)
            var = jnp.mean((y - mean) ** 2, axis=(0, 2, 3), keepdims=True)
            yn = (y - mean) * jax.lax.rsqrt(var + 1e-5)
            yn = yn * g.reshape(1, -1, 1, 1) + be.reshape(1, -1, 1, 1)
            a = jnp.where(yn >= 0, yn, 0.2 * yn)
    return a


if __name__ == "__main__":
    key = jax.random.PRNGKey(0)
    kx, kp = jax.random.split(key)

    # Small config consistent with the module: Discriminator(in_channels=3,
    # base_width=16, num_layers=3) on 16x16 inputs -> 16 -> 8 -> 4 -> 1.
    N, C_in, H, W = 2, 3, 16, 16
    base_width, num_layers = 16, 3

    x = jax.random.normal(kx, (N, C_in, H, W), dtype=jnp.float32)
    params, config = make_discriminator_params(kp, C_in, base_width, num_layers)

    out = discriminator_forward(x, params, config)
    jax.block_until_ready(out)

    ref = _reference_forward(x, params, config)
    assert out.shape == ref.shape == (N, 1, 1, 1), (out.shape, ref.shape)
    err = float(jnp.max(jnp.abs(out - ref)))
    assert jnp.all(jnp.isfinite(out)), "non-finite output"
    # bf16 matmul operands / bf16 y stash -> loosened tolerance vs f32 reference
    assert err < 0.1, f"max abs diff vs f32 reference: {err}"

    print("KERNEL_OK")
</pallas_src>

<mosaic_0001>
module attributes {stable_mosaic.version = 11 : i64} {
  func.func @_conv_stats_kernel(%arg0: i32, %arg1: memref<48x128xbf16, #tpu.memory_space<vmem>>, %arg2: memref<16x48xbf16, #tpu.memory_space<vmem>>, %arg3: memref<16x128xbf16, #tpu.memory_space<vmem>>, %arg4: memref<16x128xf32, #tpu.memory_space<vmem>>, %arg5: memref<16x128xf32, #tpu.memory_space<vmem>>) attributes {dimension_semantics = [#tpu.dimension_semantics<parallel>], iteration_bounds = array<i64: 1>, scalar_prefetch = 0 : i64, scratch_operands = 0 : i64, tpu.core_type = #tpu.core_type<tc>, window_params = [{transform_indices = @transform_0, window_bounds = array<i64: 48, 128>}, {pipeline_mode = #tpu.pipeline_mode<synchronous>, transform_indices = @transform_1, window_bounds = array<i64: 16, 48>}, {transform_indices = @transform_2, window_bounds = array<i64: 16, 128>}, {transform_indices = @transform_3, window_bounds = array<i64: 16, 128>}, {transform_indices = @transform_4, window_bounds = array<i64: 16, 128>}]} {
    %c0 = arith.constant 0 : index
    %c0_0 = arith.constant 0 : index
    %0 = vector.load %arg2[%c0, %c0_0] : memref<16x48xbf16, #tpu.memory_space<vmem>>, vector<16x48xbf16>
    %c0_1 = arith.constant 0 : index
    %c0_2 = arith.constant 0 : index
    %1 = vector.load %arg1[%c0_1, %c0_2] : memref<48x128xbf16, #tpu.memory_space<vmem>>, vector<48x128xbf16>
    %cst = arith.constant dense<0.000000e+00> : vector<16x128xf32>
    %2 = tpu.matmul %0, %1, %cst {dimension_numbers = #tpu.dot_dimension_numbers<[1], [0], [0], [1], [0, 0, 1, 1], [], []>} : vector<16x48xbf16>, vector<48x128xbf16>, vector<16x128xf32> -> vector<16x128xf32>
    %3 = arith.truncf %2 : vector<16x128xf32> to vector<16x128xbf16>
    %c0_3 = arith.constant 0 : index
    %c0_4 = arith.constant 0 : index
    %4 = vector.load %arg3[%c0_3, %c0_4] : memref<16x128xbf16, #tpu.memory_space<vmem>>, vector<16x128xbf16>
    tpu.vector_store %arg3[%c0_3, %c0_4], %3 {strides = array<i32>} : memref<16x128xbf16, #tpu.memory_space<vmem>>, vector<16x128xbf16>,
    %5 = arith.mulf %2, %2 : vector<16x128xf32>
    %c0_5 = arith.constant 0 : index
    %c0_6 = arith.constant 0 : index
    %6 = vector.load %arg4[%c0_5, %c0_6] : memref<16x128xf32, #tpu.memory_space<vmem>>, vector<16x128xf32>
    tpu.vector_store %arg4[%c0_5, %c0_6], %2 {strides = array<i32>} : memref<16x128xf32, #tpu.memory_space<vmem>>, vector<16x128xf32>,
    %c0_7 = arith.constant 0 : index
    %c0_8 = arith.constant 0 : index
    %7 = vector.load %arg5[%c0_7, %c0_8] : memref<16x128xf32, #tpu.memory_space<vmem>>, vector<16x128xf32>
    tpu.vector_store %arg5[%c0_7, %c0_8], %5 {strides = array<i32>} : memref<16x128xf32, #tpu.memory_space<vmem>>, vector<16x128xf32>,
    return
  }
  func.func @transform_0(%arg0: i32) -> (i32, i32) {
    %c0_i32 = arith.constant 0 : i32
    %c0_i32_0 = arith.constant 0 : i32
    return %c0_i32, %arg0 : i32, i32
  }
  func.func @transform_1(%arg0: i32) -> (i32, i32) {
    %c0_i32 = arith.constant 0 : i32
    %c0_i32_0 = arith.constant 0 : i32
    %c0_i32_1 = arith.constant 0 : i32
    return %c0_i32, %c0_i32_0 : i32, i32
  }
  func.func @transform_2(%arg0: i32) -> (i32, i32) {
    %c0_i32 = arith.constant 0 : i32
    %c0_i32_0 = arith.constant 0 : i32
    return %c0_i32, %arg0 : i32, i32
  }
  func.func @transform_3(%arg0: i32) -> (i32, i32) {
    %c0_i32 = arith.constant 0 : i32
    %c0_i32_0 = arith.constant 0 : i32
    return %c0_i32, %arg0 : i32, i32
  }
  func.func @transform_4(%arg0: i32) -> (i32, i32) {
    %c0_i32 = arith.constant 0 : i32
    %c0_i32_0 = arith.constant 0 : i32
    return %c0_i32, %arg0 : i32, i32
  }
}

module attributes {stable_mosaic.version = 11 : i64} {
  func.func @_bn_lrelu_kernel(%arg0: i32, %arg1: memref<16x128xbf16, #tpu.memory_space<vmem>>, %arg2: memref<16x1xf32, #tpu.memory_space<vmem>>, %arg3: memref<16x1xf32, #tpu.memory_space<vmem>>, %arg4: memref<16x128xbf16, #tpu.memory_space<vmem>>) attributes {dimension_semantics = [#tpu.dimension_semantics<parallel>], iteration_bounds = array<i64: 1>, scalar_prefetch = 0 : i64, scratch_operands = 0 : i64, tpu.core_type = #tpu.core_type<tc>, window_params = [{transform_indices = @transform_0, window_bounds = array<i64: 16, 128>}, {pipeline_mode = #tpu.pipeline_mode<synchronous>, transform_indices = @transform_1, window_bounds = array<i64: 16, 1>}, {pipeline_mode = #tpu.pipeline_mode<synchronous>, transform_indices = @transform_2, window_bounds = array<i64: 16, 1>}, {transform_indices = @transform_3, window_bounds = array<i64: 16, 128>}]} {
    %c0 = arith.constant 0 : index
    %c0_0 = arith.constant 0 : index
    %0 = vector.load %arg1[%c0, %c0_0] : memref<16x128xbf16, #tpu.memory_space<vmem>>, vector<16x128xbf16>
    %1 = arith.extf %0 : vector<16x128xbf16> to vector<16x128xf32>
    %c0_1 = arith.constant 0 : index
    %c0_2 = arith.constant 0 : index
    %2 = vector.load %arg2[%c0_1, %c0_2] : memref<16x1xf32, #tpu.memory_space<vmem>>, vector<16x1xf32>
    %3 = vector.broadcast %2 : vector<16x1xf32> to vector<16x128xf32>
    %4 = arith.mulf %1, %3 : vector<16x128xf32>
    %c0_3 = arith.constant 0 : index
    %c0_4 = arith.constant 0 : index
    %5 = vector.load %arg3[%c0_3, %c0_4] : memref<16x1xf32, #tpu.memory_space<vmem>>, vector<16x1xf32>
    %6 = vector.broadcast %5 : vector<16x1xf32> to vector<16x128xf32>
    %7 = arith.addf %4, %6 : vector<16x128xf32>
    %cst = arith.constant 0.000000e+00 : f32
    %8 = vector.broadcast %cst : f32 to vector<16x128xf32>
    %9 = arith.cmpf oge, %7, %8 : vector<16x128xf32>
    %cst_5 = arith.constant 2.000000e-01 : f32
    %10 = vector.broadcast %cst_5 : f32 to vector<16x128xf32>
    %11 = arith.mulf %10, %7 : vector<16x128xf32>
    %12 = arith.select %9, %7, %11 : vector<16x128xi1>, vector<16x128xf32>
    %13 = arith.truncf %12 : vector<16x128xf32> to vector<16x128xbf16>
    %c0_6 = arith.constant 0 : index
    %c0_7 = arith.constant 0 : index
    %14 = vector.load %arg4[%c0_6, %c0_7] : memref<16x128xbf16, #tpu.memory_space<vmem>>, vector<16x128xbf16>
    tpu.vector_store %arg4[%c0_6, %c0_7], %13 {strides = array<i32>} : memref<16x128xbf16, #tpu.memory_space<vmem>>, vector<16x128xbf16>,
    return
  }
  func.func @transform_0(%arg0: i32) -> (i32, i32) {
    %c0_i32 = arith.constant 0 : i32
    %c0_i32_0 = arith.constant 0 : i32
    return %c0_i32, %arg0 : i32, i32
  }
  func.func @transform_1(%arg0: i32) -> (i32, i32) {
    %c0_i32 = arith.constant 0 : i32
    %c0_i32_0 = arith.constant 0 : i32
    %c0_i32_1 = arith.constant 0 : i32
    return %c0_i32, %c0_i32_0 : i32, i32
  }
  func.func @transform_2(%arg0: i32) -> (i32, i32) {
    %c0_i32 = arith.constant 0 : i32
    %c0_i32_0 = arith.constant 0 : i32
    %c0_i32_1 = arith.constant 0 : i32
    return %c0_i32, %c0_i32_0 : i32, i32
  }
  func.func @transform_3(%arg0: i32) -> (i32, i32) {
    %c0_i32 = arith.constant 0 : i32
    %c0_i32_0 = arith.constant 0 : i32
    return %c0_i32, %arg0 : i32, i32
  }
}

module attributes {stable_mosaic.version = 11 : i64} {
  func.func @_conv_stats_kernel(%arg0: i32, %arg1: memref<256x128xbf16, #tpu.memory_space<vmem>>, %arg2: memref<32x256xbf16, #tpu.memory_space<vmem>>, %arg3: memref<32x128xbf16, #tpu.memory_space<vmem>>, %arg4: memref<32x128xf32, #tpu.memory_space<vmem>>, %arg5: memref<32x128xf32, #tpu.memory_space<vmem>>) attributes {dimension_semantics = [#tpu.dimension_semantics<parallel>], iteration_bounds = array<i64: 1>, scalar_prefetch = 0 : i64, scratch_operands = 0 : i64, tpu.core_type = #tpu.core_type<tc>, window_params = [{transform_indices = @transform_0, window_bounds = array<i64: 256, 128>}, {pipeline_mode = #tpu.pipeline_mode<synchronous>, transform_indices = @transform_1, window_bounds = array<i64: 32, 256>}, {transform_indices = @transform_2, window_bounds = array<i64: 32, 128>}, {transform_indices = @transform_3, window_bounds = array<i64: 32, 128>}, {transform_indices = @transform_4, window_bounds = array<i64: 32, 128>}]} {
    %c0 = arith.constant 0 : index
    %c0_0 = arith.constant 0 : index
    %0 = vector.load %arg2[%c0, %c0_0] : memref<32x256xbf16, #tpu.memory_space<vmem>>, vector<32x256xbf16>
    %c0_1 = arith.constant 0 : index
    %c0_2 = arith.constant 0 : index
    %1 = vector.load %arg1[%c0_1, %c0_2] : memref<256x128xbf16, #tpu.memory_space<vmem>>, vector<256x128xbf16>
    %cst = arith.constant dense<0.000000e+00> : vector<32x128xf32>
    %2 = tpu.matmul %0, %1, %cst {dimension_numbers = #tpu.dot_dimension_numbers<[1], [0], [0], [1], [0, 0, 1, 1], [], []>} : vector<32x256xbf16>, vector<256x128xbf16>, vector<32x128xf32> -> vector<32x128xf32>
    %3 = arith.truncf %2 : vector<32x128xf32> to vector<32x128xbf16>
    %c0_3 = arith.constant 0 : index
    %c0_4 = arith.constant 0 : index
    %4 = vector.load %arg3[%c0_3, %c0_4] : memref<32x128xbf16, #tpu.memory_space<vmem>>, vector<32x128xbf16>
    tpu.vector_store %arg3[%c0_3, %c0_4], %3 {strides = array<i32>} : memref<32x128xbf16, #tpu.memory_space<vmem>>, vector<32x128xbf16>,
    %5 = arith.mulf %2, %2 : vector<32x128xf32>
    %c0_5 = arith.constant 0 : index
    %c0_6 = arith.constant 0 : index
    %6 = vector.load %arg4[%c0_5, %c0_6] : memref<32x128xf32, #tpu.memory_space<vmem>>, vector<32x128xf32>
    tpu.vector_store %arg4[%c0_5, %c0_6], %2 {strides = array<i32>} : memref<32x128xf32, #tpu.memory_space<vmem>>, vector<32x128xf32>,
    %c0_7 = arith.constant 0 : index
    %c0_8 = arith.constant 0 : index
    %7 = vector.load %arg5[%c0_7, %c0_8] : memref<32x128xf32, #tpu.memory_space<vmem>>, vector<32x128xf32>
    tpu.vector_store %arg5[%c0_7, %c0_8], %5 {strides = array<i32>} : memref<32x128xf32, #tpu.memory_space<vmem>>, vector<32x128xf32>,
    return
  }
  func.func @transform_0(%arg0: i32) -> (i32, i32) {
    %c0_i32 = arith.constant 0 : i32
    %c0_i32_0 = arith.constant 0 : i32
    return %c0_i32, %arg0 : i32, i32
  }
  func.func @transform_1(%arg0: i32) -> (i32, i32) {
    %c0_i32 = arith.constant 0 : i32
    %c0_i32_0 = arith.constant 0 : i32
    %c0_i32_1 = arith.constant 0 : i32
    return %c0_i32, %c0_i32_0 : i32, i32
  }
  func.func @transform_2(%arg0: i32) -> (i32, i32) {
    %c0_i32 = arith.constant 0 : i32
    %c0_i32_0 = arith.constant 0 : i32
    return %c0_i32, %arg0 : i32, i32
  }
  func.func @transform_3(%arg0: i32) -> (i32, i32) {
    %c0_i32 = arith.constant 0 : i32
    %c0_i32_0 = arith.constant 0 : i32
    return %c0_i32, %arg0 : i32, i32
  }
  func.func @transform_4(%arg0: i32) -> (i32, i32) {
    %c0_i32 = arith.constant 0 : i32
    %c0_i32_0 = arith.constant 0 : i32
    return %c0_i32, %arg0 : i32, i32
  }
}

module attributes {stable_mosaic.version = 11 : i64} {
  func.func @_bn_lrelu_kernel(%arg0: i32, %arg1: memref<32x128xbf16, #tpu.memory_space<vmem>>, %arg2: memref<32x1xf32, #tpu.memory_space<vmem>>, %arg3: memref<32x1xf32, #tpu.memory_space<vmem>>, %arg4: memref<32x128xbf16, #tpu.memory_space<vmem>>) attributes {dimension_semantics = [#tpu.dimension_semantics<parallel>], iteration_bounds = array<i64: 1>, scalar_prefetch = 0 : i64, scratch_operands = 0 : i64, tpu.core_type = #tpu.core_type<tc>, window_params = [{transform_indices = @transform_0, window_bounds = array<i64: 32, 128>}, {pipeline_mode = #tpu.pipeline_mode<synchronous>, transform_indices = @transform_1, window_bounds = array<i64: 32, 1>}, {pipeline_mode = #tpu.pipeline_mode<synchronous>, transform_indices = @transform_2, window_bounds = array<i64: 32, 1>}, {transform_indices = @transform_3, window_bounds = array<i64: 32, 128>}]} {
    %c0 = arith.constant 0 : index
    %c0_0 = arith.constant 0 : index
    %0 = vector.load %arg1[%c0, %c0_0] : memref<32x128xbf16, #tpu.memory_space<vmem>>, vector<32x128xbf16>
    %1 = arith.extf %0 : vector<32x128xbf16> to vector<32x128xf32>
    %c0_1 = arith.constant 0 : index
    %c0_2 = arith.constant 0 : index
    %2 = vector.load %arg2[%c0_1, %c0_2] : memref<32x1xf32, #tpu.memory_space<vmem>>, vector<32x1xf32>
    %3 = vector.broadcast %2 : vector<32x1xf32> to vector<32x128xf32>
    %4 = arith.mulf %1, %3 : vector<32x128xf32>
    %c0_3 = arith.constant 0 : index
    %c0_4 = arith.constant 0 : index
    %5 = vector.load %arg3[%c0_3, %c0_4] : memref<32x1xf32, #tpu.memory_space<vmem>>, vector<32x1xf32>
    %6 = vector.broadcast %5 : vector<32x1xf32> to vector<32x128xf32>
    %7 = arith.addf %4, %6 : vector<32x128xf32>
    %cst = arith.constant 0.000000e+00 : f32
    %8 = vector.broadcast %cst : f32 to vector<32x128xf32>
    %9 = arith.cmpf oge, %7, %8 : vector<32x128xf32>
    %cst_5 = arith.constant 2.000000e-01 : f32
    %10 = vector.broadcast %cst_5 : f32 to vector<32x128xf32>
    %11 = arith.mulf %10, %7 : vector<32x128xf32>
    %12 = arith.select %9, %7, %11 : vector<32x128xi1>, vector<32x128xf32>
    %13 = arith.truncf %12 : vector<32x128xf32> to vector<32x128xbf16>
    %c0_6 = arith.constant 0 : index
    %c0_7 = arith.constant 0 : index
    %14 = vector.load %arg4[%c0_6, %c0_7] : memref<32x128xbf16, #tpu.memory_space<vmem>>, vector<32x128xbf16>
    tpu.vector_store %arg4[%c0_6, %c0_7], %13 {strides = array<i32>} : memref<32x128xbf16, #tpu.memory_space<vmem>>, vector<32x128xbf16>,
    return
  }
  func.func @transform_0(%arg0: i32) -> (i32, i32) {
    %c0_i32 = arith.constant 0 : i32
    %c0_i32_0 = arith.constant 0 : i32
    return %c0_i32, %arg0 : i32, i32
  }
  func.func @transform_1(%arg0: i32) -> (i32, i32) {
    %c0_i32 = arith.constant 0 : i32
    %c0_i32_0 = arith.constant 0 : i32
    %c0_i32_1 = arith.constant 0 : i32
    return %c0_i32, %c0_i32_0 : i32, i32
  }
  func.func @transform_2(%arg0: i32) -> (i32, i32) {
    %c0_i32 = arith.constant 0 : i32
    %c0_i32_0 = arith.constant 0 : i32
    %c0_i32_1 = arith.constant 0 : i32
    return %c0_i32, %c0_i32_0 : i32, i32
  }
  func.func @transform_3(%arg0: i32) -> (i32, i32) {
    %c0_i32 = arith.constant 0 : i32
    %c0_i32_0 = arith.constant 0 : i32
    return %c0_i32, %arg0 : i32, i32
  }
}

module attributes {stable_mosaic.version = 11 : i64} {
  func.func @_conv_bias_sigmoid_kernel(%arg0: i32, %arg1: memref<512x128xbf16, #tpu.memory_space<vmem>>, %arg2: memref<1x512xbf16, #tpu.memory_space<vmem>>, %arg3: memref<1x1xf32, #tpu.memory_space<vmem>>, %arg4: memref<1x128xf32, #tpu.memory_space<vmem>>) attributes {dimension_semantics = [#tpu.dimension_semantics<parallel>], iteration_bounds = array<i64: 1>, scalar_prefetch = 0 : i64, scratch_operands = 0 : i64, tpu.core_type = #tpu.core_type<tc>, window_params = [{transform_indices = @transform_0, window_bounds = array<i64: 512, 128>}, {pipeline_mode = #tpu.pipeline_mode<synchronous>, transform_indices = @transform_1, window_bounds = array<i64: 1, 512>}, {pipeline_mode = #tpu.pipeline_mode<synchronous>, transform_indices = @transform_2, window_bounds = array<i64: 1, 1>}, {transform_indices = @transform_3, window_bounds = array<i64: 1, 128>}]} {
    %c0 = arith.constant 0 : index
    %c0_0 = arith.constant 0 : index
    %0 = vector.load %arg2[%c0, %c0_0] : memref<1x512xbf16, #tpu.memory_space<vmem>>, vector<1x512xbf16>
    %c0_1 = arith.constant 0 : index
    %c0_2 = arith.constant 0 : index
    %1 = vector.load %arg1[%c0_1, %c0_2] : memref<512x128xbf16, #tpu.memory_space<vmem>>, vector<512x128xbf16>
    %cst = arith.constant dense<0.000000e+00> : vector<1x128xf32>
    %2 = tpu.matmul %0, %1, %cst {dimension_numbers = #tpu.dot_dimension_numbers<[1], [0], [0], [1], [0, 0, 1, 1], [], []>} : vector<1x512xbf16>, vector<512x128xbf16>, vector<1x128xf32> -> vector<1x128xf32>
    %c0_3 = arith.constant 0 : index
    %c0_4 = arith.constant 0 : index
    %3 = vector.load %arg3[%c0_3, %c0_4] : memref<1x1xf32, #tpu.memory_space<vmem>>, vector<1x1xf32>
    %4 = vector.broadcast %3 : vector<1x1xf32> to vector<1x128xf32>
    %5 = arith.addf %2, %4 : vector<1x128xf32>
    %6 = arith.negf %5 : vector<1x128xf32>
    %7 = math.exp %6 : vector<1x128xf32>
    %cst_5 = arith.constant 1.000000e+00 : f32
    %8 = vector.broadcast %cst_5 : f32 to vector<1x128xf32>
    %9 = arith.addf %8, %7 : vector<1x128xf32>
    %10 = arith.divf %8, %9 : vector<1x128xf32>
    %c0_6 = arith.constant 0 : index
    %c0_7 = arith.constant 0 : index
    %11 = vector.load %arg4[%c0_6, %c0_7] : memref<1x128xf32, #tpu.memory_space<vmem>>, vector<1x128xf32>
    tpu.vector_store %arg4[%c0_6, %c0_7], %10 {strides = array<i32>} : memref<1x128xf32, #tpu.memory_space<vmem>>, vector<1x128xf32>,
    return
  }
  func.func @transform_0(%arg0: i32) -> (i32, i32) {
    %c0_i32 = arith.constant 0 : i32
    %c0_i32_0 = arith.constant 0 : i32
    return %c0_i32, %arg0 : i32, i32
  }
  func.func @transform_1(%arg0: i32) -> (i32, i32) {
    %c0_i32 = arith.constant 0 : i32
    %c0_i32_0 = arith.constant 0 : i32
    %c0_i32_1 = arith.constant 0 : i32
    return %c0_i32, %c0_i32_0 : i32, i32
  }
  func.func @transform_2(%arg0: i32) -> (i32, i32) {
    %c0_i32 = arith.constant 0 : i32
    %c0_i32_0 = arith.constant 0 : i32
    %c0_i32_1 = arith.constant 0 : i32
    return %c0_i32, %c0_i32_0 : i32, i32
  }
  func.func @transform_3(%arg0: i32) -> (i32, i32) {
    %c0_i32 = arith.constant 0 : i32
    %c0_i32_0 = arith.constant 0 : i32
    return %c0_i32, %arg0 : i32, i32
  }
}

</mosaic_0001>

<bundles_post_ra>
// kernel: discriminator_forward.6
= control target key start
LH: loop header
LB: loop body
LE: loop exit
PB: predicated region body
PF: predicated region fallthrough
CT: control target
= control target key end

     0   :  { %v82_v0 = vmov 0   ;;  %s121_s2 = inlined_call_operand.vmem [shape: f32[16,1], index: 2, kind: input, shape index: {}]   ;;  %s122_s1 = inlined_call_operand.vmem [shape: f32[16,1], index: 1, kind: input, shape index: {}]   ;;  %s123_s0 = inlined_call_operand.vmem [shape: bf16[16,128], index: 0, kind: input, shape index: {}, may-alias: {0,3}]   ;;  %s124_s3 = inlined_call_operand.vmem [shape: bf16[16,128], index: 3, kind: output, shape index: {}, may-alias: {0,3}]  }
   0x1   :  { %81 = vset.pattern.permute.xlu1 %v82_v0  ;;  %80 = vset.pattern.permute.xlu0 %v82_v0  ;;  %v32_v1 = vld [vmem:[%s121_s2] sm:$0xff]  ;;  %v33_v3 = vld [vmem:[%s121_s2 + $0x8] sm:$0xff] }
   0x2   :  { %v18_v2 = vld [vmem:[%s122_s1] sm:$0xff]  ;;  %36 = vperm.xlu1 %81, %v32_v1   ;;  %v19_v4 = vld [vmem:[%s122_s1 + $0x8] sm:$0xff] }
   0x3   :  { %22 = vperm.xlu0 %80, %v18_v2   ;;  %v71_v5 = vld [vmem:[%s123_s0] sm:$0xff]  }
   0x4   :  { %v72_v6 = vunpack.c.l.bf16 %v71_v5  ;;  %v73_v10 = vunpack.c.h.bf16 %v71_v5 }
   0x6   :  { %41 = vperm.xlu1 %81, %v33_v3  }
   0x7   :  { %27 = vperm.xlu0 %80, %v19_v4  }
  0x81   :  { %v37_v7 = vpop.permute.xlu1 %36 }
  0x82   :  { %v23_v8 = vpop.permute.xlu0 %22 }
  0x83   :  { %v30_v9 = vmul.f32 %v72_v6, %v23_v8 }
  0x85   :  { %v44_v11 = vadd.f32 %v37_v7, %v30_v9  ;;  %v42_v14 = vpop.permute.xlu1 %41 }
  0x86   :  { %v28_v12 = vpop.permute.xlu0 %27 }
  0x87   :  { %v31_v13 = vmul.f32 %v73_v10, %v28_v12  ;;  %v48_v15 = vmul.f32 0.2, %v44_v11  ;;  %vm46_vm0 = vcmp.ge.f32.partialorder %v44_v11, 0.0 }
  0x89   :  { %v45_v16 = vadd.f32 %v42_v14, %v31_v13  ;;  %v50_v18 = vsel %vm46_vm0, %v44_v11, %v48_v15 }
  0x8b   :  { %vm47_vm1 = vcmp.ge.f32.partialorder %v45_v16, 0.0  ;;  %v49_v17 = vmul.f32 0.2, %v45_v16 }
  0x8d   :  { %v51_v19 = vsel %vm47_vm1, %v45_v16, %v49_v17 }
  0x8e   :  { %v77_v20 = vpack.c.bf16 %v51_v19, %v50_v18 }
  0x90   :  { %78 = vst [vmem:[%s124_s3] sm:$0xff] %v77_v20  }

// kernel: discriminator_forward.5
= control target key start
LH: loop header
LB: loop body
LE: loop exit
PB: predicated region body
PF: predicated region fallthrough
CT: control target
= control target key end

     0   :  { %v153_v0 = vmov 0.0   ;;  %vm154_vm0 = vmmov 0   ;;  %vm46_vm1 = vcmask 392192   ;;  %s207_s0 = inlined_call_operand.vmem [shape: bf16[48,128], index: 0, kind: input, shape index: {}]   ;;  %s208_s1 = inlined_call_operand.vmem [shape: bf16[16,48], index: 1, kind: input, shape index: {}]   ;;  %s209_s3 = inlined_call_operand.vmem [shape: f32[16,128], index: 3, kind: output, shape index: {1}]   ;;  %s210_s4 = inlined_call_operand.vmem [shape: f32[16,128], index: 4, kind: output, shape index: {2}]   ;;  %s211_s2 = inlined_call_operand.vmem [shape: bf16[16,128], index: 2, kind: output, shape index: {0}]  }
   0x1   :  { %137 = vmatprep.subr.bf16.mxu0 %v153_v0  ;;  %v149_v1 = vld [vmem:[%s207_s0] sm:$0xff]   ;;  %143 = vmatprep.mubr.msk.bf16.mxu0 %vm154_vm0, %v153_v0  ;;  %v150_v2 = vld [vmem:[%s207_s0 + $0x8] sm:$0xff]   ;;  %v151_v3 = vld [vmem:[%s207_s0 + $0x10] sm:$0xff]  }
   0x2   :  { %138 = vmatpush3.bf16.msra.mxu0 %v149_v1  ;;  %v152_v4 = vld [vmem:[%s208_s1] sm:$0xff]  }
   0x3   :  { %139 = vmatprep.subr.bf16.mxu0 %v153_v0 }
   0x6   :  { %140 = vmatpush3.bf16.msra.mxu0 %v150_v2 }
   0x7   :  { %141 = vmatprep.subr.bf16.mxu0 %v153_v0 }
   0xa   :  { %142 = vmatpush3.bf16.msra.mxu0 %v151_v3 }
   0xd   :  { %144 = vmatmul.mubr.msk.bf16.vlgmr.msra.gmra.mrb[0].mxu0 %vm46_vm1, %v152_v4 }
  0xe0   :  { %v84_v5 = vpop.f32.mrb[0].mxu0 }
  0xe1   :  { %v101_v6 = vmul.f32 %v84_v5, %v84_v5  ;;  %103 = vst [vmem:[%s209_s3] sm:$0xff] %v84_v5  ;;  %v145_v7 = vpop.f32.mrb[1].mxu0 }
  0xe2   :  { %v87_v8 = vpop.f32.mrb[2].mxu0 }
  0xe3   :  { %105 = vst [vmem:[%s210_s4] sm:$0xff] %v101_v6  ;;  %v131_v9 = vpack.c.bf16 %v87_v8, %v84_v5  ;;  %v102_v10 = vmul.f32 %v87_v8, %v87_v8  ;;  %104 = vst [vmem:[%s209_s3 + $0x8] sm:$0xff] %v87_v8  ;;  %v146_v11 = vpop.f32.mrb[3].mxu0 }
  0xe5   :  { %132 = vst [vmem:[%s211_s2] sm:$0xff] %v131_v9   ;;  %106 = vst [vmem:[%s210_s4 + $0x8] sm:$0xff] %v102_v10 }

// kernel: discriminator_forward.7
= control target key start
LH: loop header
LB: loop body
LE: loop exit
PB: predicated region body
PF: predicated region fallthrough
CT: control target
= control target key end

     0   :  { %s480_s0 = inlined_call_operand.vmem [shape: bf16[256,128], index: 0, kind: input, shape index: {}]   ;;  %s481_s1 = inlined_call_operand.vmem [shape: bf16[32,256], index: 1, kind: input, shape index: {}]   ;;  %s482_s3 = inlined_call_operand.vmem [shape: f32[32,128], index: 3, kind: output, shape index: {1}]   ;;  %s483_s4 = inlined_call_operand.vmem [shape: f32[32,128], index: 4, kind: output, shape index: {2}]   ;;  %s484_s2 = inlined_call_operand.vmem [shape: bf16[32,128], index: 2, kind: output, shape index: {0}]  }
   0x1   :  { %v343_v0 = vld [vmem:[%s480_s0 + $0x40] sm:$0xff]   ;;  %v345_v2 = vld [vmem:[%s480_s0 + $0x48] sm:$0xff]   ;;  %v347_v4 = vld [vmem:[%s480_s0 + $0x50] sm:$0xff]  }
   0x2   :  { %v344_v1 = vld [vmem:[%s480_s0] sm:$0xff]   ;;  %299 = vmatprep.subr.bf16.mxu0 %v343_v0  ;;  %327 = vmatprep.subr.bf16.mxu1 %v343_v0  ;;  %v346_v3 = vld [vmem:[%s480_s0 + $0x8] sm:$0xff]   ;;  %v348_v5 = vld [vmem:[%s480_s0 + $0x10] sm:$0xff]  }
   0x3   :  { %300 = vmatpush3.bf16.msra.mxu0 %v344_v1  ;;  %335 = vmatpush3.bf16.msra.mxu1 %v344_v1  ;;  %v349_v6 = vld [vmem:[%s480_s0 + $0x58] sm:$0xff]   ;;  %v351_v8 = vld [vmem:[%s480_s0 + $0x60] sm:$0xff]   ;;  %v353_v10 = vld [vmem:[%s480_s0 + $0x68] sm:$0xff]  }
   0x4   :  { %301 = vmatprep.subr.bf16.mxu0 %v345_v2  ;;  %328 = vmatprep.subr.bf16.mxu1 %v345_v2  ;;  %v350_v7 = vld [vmem:[%s480_s0 + $0x18] sm:$0xff]   ;;  %v352_v9 = vld [vmem:[%s480_s0 + $0x20] sm:$0xff]   ;;  %v354_v13 = vld [vmem:[%s480_s0 + $0x28] sm:$0xff]  }
   0x5   :  { %v361_v11 = vld [vmem:[%s481_s1 + $0x4] ss:$8 sps:$4 sm:$0xff]   ;;  %v364_v12 = vld [vmem:[%s481_s1 + $0x14] ss:$8 sps:$4 sm:$0xff]   ;;  %v359_v18 = vld [vmem:[%s481_s1] ss:$8 sps:$4 sm:$0xff]  }
   0x6   :  { %v355_v14 = vld [vmem:[%s480_s0 + $0x70] sm:$0xff]   ;;  %199 = vmatprep.mubr.bf16.mxu0 %v361_v11  ;;  %207 = vmatprep.mubr.bf16.mxu1 %v364_v12  ;;  %v357_v16 = vld [vmem:[%s480_s0 + $0x78] sm:$0xff]  }
   0x7   :  { %302 = vmatpush3.bf16.msra.mxu0 %v346_v3  ;;  %336 = vmatpush3.bf16.msra.mxu1 %v346_v3  ;;  %v356_v15 = vld [vmem:[%s480_s0 + $0x30] sm:$0xff]   ;;  %v358_v17 = vld [vmem:[%s480_s0 + $0x38] sm:$0xff]  }
   0x8   :  { %303 = vmatprep.subr.bf16.mxu0 %v347_v4  ;;  %329 = vmatprep.subr.bf16.mxu1 %v347_v4  ;;  %v362_v19 = vld [vmem:[%s481_s1 + $0x10] ss:$8 sps:$4 sm:$0xff]  }
   0xb   :  { %304 = vmatpush3.bf16.msra.mxu0 %v348_v5  ;;  %337 = vmatpush3.bf16.msra.mxu1 %v348_v5 }
   0xc   :  { %305 = vmatprep.subr.bf16.mxu0 %v349_v6  ;;  %330 = vmatprep.subr.bf16.mxu1 %v349_v6 }
   0xf   :  { %306 = vmatpush3.bf16.msra.mxu0 %v350_v7  ;;  %338 = vmatpush3.bf16.msra.mxu1 %v350_v7 }
  0x10   :  { %307 = vmatprep.subr.bf16.mxu0 %v351_v8  ;;  %331 = vmatprep.subr.bf16.mxu1 %v351_v8 }
  0x13   :  { %308 = vmatpush3.bf16.msra.mxu0 %v352_v9  ;;  %339 = vmatpush3.bf16.msra.mxu1 %v352_v9 }
  0x14   :  { %309 = vmatprep.subr.bf16.mxu0 %v353_v10  ;;  %332 = vmatprep.subr.bf16.mxu1 %v353_v10 }
  0x17   :  { %310 = vmatpush3.bf16.msra.mxu0 %v354_v13  ;;  %340 = vmatpush3.bf16.msra.mxu1 %v354_v13 }
  0x18   :  { %311 = vmatprep.subr.bf16.mxu0 %v355_v14  ;;  %333 = vmatprep.subr.bf16.mxu1 %v355_v14 }
  0x1b   :  { %312 = vmatpush3.bf16.msra.mxu0 %v356_v15  ;;  %341 = vmatpush3.bf16.msra.mxu1 %v356_v15 }
  0x1c   :  { %313 = vmatprep.subr.bf16.mxu0 %v357_v16  ;;  %334 = vmatprep.subr.bf16.mxu1 %v357_v16 }
  0x1f   :  { %314 = vmatpush3.bf16.msra.mxu0 %v358_v17  ;;  %342 = vmatpush3.bf16.msra.mxu1 %v358_v17 }
  0x22   :  { %200 = vmatmul.mubr.bf16.vlgmr.msra.gmra.mrb[0].mxu0 %v359_v18  ;;  %208 = vmatmul.mubr.bf16.vlgmr.msra.gmra.mrb[0].mxu1 %v362_v19 }
  0xf5   :  { %v315_v20 = vpop.f32.mrb[0].mxu0  ;;  %v321_v21 = vpop.f32.mrb[0].mxu1 }
  0xf6   :  { %v316_v22 = vpop.f32.mrb[1].mxu0  ;;  %v322_v23 = vpop.f32.mrb[1].mxu1 }
  0xf7   :  { %v317_v24 = vadd.f32 %v316_v22, %v315_v20  ;;  %v323_v25 = vadd.f32 %v322_v23, %v321_v21  ;;  %v318_v26 = vpop.f32.mrb[2].mxu0  ;;  %v324_v27 = vpop.f32.mrb[2].mxu1 }
  0xf8   :  { %v319_v28 = vpop.f32.mrb[3].mxu0  ;;  %v325_v29 = vpop.f32.mrb[3].mxu1 }
  0xf9   :  { %v236_v30 = vmul.f32 %v317_v24, %v317_v24  ;;  %240 = vst [vmem:[%s482_s3] sm:$0xff] %v317_v24  ;;  %v238_v31 = vmul.f32 %v323_v25, %v323_v25  ;;  %242 = vst [vmem:[%s482_s3 + $0x10] sm:$0xff] %v323_v25  ;;  %v320_v32 = vadd.f32 %v319_v28, %v318_v26 }
  0xfa   :  { %v326_v33 = vadd.f32 %v325_v29, %v324_v27 }
  0xfb   :  { %244 = vst [vmem:[%s483_s4] sm:$0xff] %v236_v30  ;;  %246 = vst [vmem:[%s483_s4 + $0x10] sm:$0xff] %v238_v31  ;;  %v291_v34 = vpack.c.bf16 %v320_v32, %v317_v24  ;;  %v237_v35 = vmul.f32 %v320_v32, %v320_v32 }
  0xfc   :  { %241 = vst [vmem:[%s482_s3 + $0x8] sm:$0xff] %v320_v32  ;;  %v296_v36 = vpack.c.bf16 %v326_v33, %v323_v25  ;;  %v239_v37 = vmul.f32 %v326_v33, %v326_v33  ;;  %243 = vst [vmem:[%s482_s3 + $0x18] sm:$0xff] %v326_v33 }
  0xfd   :  { %292 = vst [vmem:[%s484_s2] sm:$0xff] %v291_v34   ;;  %245 = vst [vmem:[%s483_s4 + $0x8] sm:$0xff] %v237_v35 }
  0xfe   :  { %298 = vst [vmem:[%s484_s2 + $0x8] sm:$0xff] %v296_v36   ;;  %247 = vst [vmem:[%s483_s4 + $0x18] sm:$0xff] %v239_v37 }

// kernel: discriminator_forward.8
= control target key start
LH: loop header
LB: loop body
LE: loop exit
PB: predicated region body
PF: predicated region fallthrough
CT: control target
= control target key end

     0   :  { %v145_v0 = vmov 0   ;;  %s202_s1 = inlined_call_operand.vmem [shape: f32[32,1], index: 1, kind: input, shape index: {}]   ;;  %s203_s2 = inlined_call_operand.vmem [shape: f32[32,1], index: 2, kind: input, shape index: {}]   ;;  %s204_s0 = inlined_call_operand.vmem [shape: bf16[32,128], index: 0, kind: input, shape index: {}, may-alias: {0,3}]   ;;  %s205_s3 = inlined_call_operand.vmem [shape: bf16[32,128], index: 3, kind: output, shape index: {}, may-alias: {0,3}]  }
   0x1   :  { %144 = vset.pattern.permute.xlu1 %v145_v0  ;;  %143 = vset.pattern.permute.xlu0 %v145_v0  ;;  %v24_v1 = vld [vmem:[%s202_s1 + $0x10] sm:$0xff]  ;;  %v22_v2 = vld [vmem:[%s202_s1] sm:$0xff]  ;;  %v25_v3 = vld [vmem:[%s202_s1 + $0x18] sm:$0xff] }
   0x2   :  { %38 = vperm.xlu1 %144, %v24_v1   ;;  %28 = vperm.xlu0 %143, %v22_v2   ;;  %v23_v4 = vld [vmem:[%s202_s1 + $0x8] sm:$0xff]  ;;  %v50_v6 = vld [vmem:[%s203_s2] sm:$0xff]  ;;  %v53_v7 = vld [vmem:[%s203_s2 + $0x18] sm:$0xff] }
   0x3   :  { %v51_v5 = vld [vmem:[%s203_s2 + $0x8] sm:$0xff]  ;;  %v52_v8 = vld [vmem:[%s203_s2 + $0x10] sm:$0xff]  ;;  %v123_v11 = vld [vmem:[%s204_s0] sm:$0xff]  }
   0x4   :  { %v140_v12 = vld [vmem:[%s204_s0 + $0x8] sm:$0xff]   ;;  %v124_v13 = vunpack.c.l.bf16 %v123_v11  ;;  %v125_v14 = vunpack.c.h.bf16 %v123_v11 }
   0x5   :  { %v128_v17 = vunpack.c.l.bf16 %v140_v12  ;;  %v129_v18 = vunpack.c.h.bf16 %v140_v12 }
   0x6   :  { %43 = vperm.xlu1 %144, %v25_v3   ;;  %33 = vperm.xlu0 %143, %v23_v4  }
   0xa   :  { %61 = vperm.xlu1 %144, %v51_v5   ;;  %56 = vperm.xlu0 %143, %v50_v6  }
   0xe   :  { %71 = vperm.xlu1 %144, %v53_v7   ;;  %66 = vperm.xlu0 %143, %v52_v8  }
  0x81   :  { %v39_v9 = vpop.permute.xlu1 %38  ;;  %v29_v10 = vpop.permute.xlu0 %28 }
  0x82   :  { %v46_v19 = vmul.f32 %v124_v13, %v29_v10  ;;  %v48_v25 = vmul.f32 %v128_v17, %v39_v9 }
  0x85   :  { %v44_v15 = vpop.permute.xlu1 %43  ;;  %v34_v16 = vpop.permute.xlu0 %33 }
  0x86   :  { %v47_v20 = vmul.f32 %v125_v14, %v34_v16  ;;  %v49_v26 = vmul.f32 %v129_v18, %v44_v15 }
  0x89   :  { %v62_v21 = vpop.permute.xlu1 %61  ;;  %v57_v22 = vpop.permute.xlu0 %56 }
  0x8a   :  { %v75_v23 = vadd.f32 %v62_v21, %v47_v20  ;;  %v74_v24 = vadd.f32 %v57_v22, %v46_v19 }
  0x8c   :  { %vm79_vm0 = vcmp.ge.f32.partialorder %v75_v23, 0.0  ;;  %v83_v27 = vmul.f32 0.2, %v75_v23  ;;  %vm78_vm1 = vcmp.ge.f32.partialorder %v74_v24, 0.0  ;;  %v82_v28 = vmul.f32 0.2, %v74_v24 }
  0x8d   :  { %v72_v29 = vpop.permute.xlu1 %71  ;;  %v67_v30 = vpop.permute.xlu0 %66 }
  0x8e   :  { %v87_v31 = vsel %vm79_vm0, %v75_v23, %v83_v27  ;;  %v86_v32 = vsel %vm78_vm1, %v74_v24, %v82_v28  ;;  %v77_v33 = vadd.f32 %v72_v29, %v49_v26  ;;  %v76_v34 = vadd.f32 %v67_v30, %v48_v25 }
  0x8f   :  { %v133_v35 = vpack.c.bf16 %v87_v31, %v86_v32 }
  0x90   :  { %vm81_vm2 = vcmp.ge.f32.partialorder %v77_v33, 0.0  ;;  %v85_v36 = vmul.f32 0.2, %v77_v33  ;;  %vm80_vm3 = vcmp.ge.f32.partialorder %v76_v34, 0.0  ;;  %v84_v37 = vmul.f32 0.2, %v76_v34 }
  0x91   :  { %134 = vst [vmem:[%s205_s3] sm:$0xff] %v133_v35  }
  0x92   :  { %v89_v38 = vsel %vm81_vm2, %v77_v33, %v85_v36  ;;  %v88_v39 = vsel %vm80_vm3, %v76_v34, %v84_v37 }
  0x93   :  { %v138_v40 = vpack.c.bf16 %v89_v38, %v88_v39 }
  0x95   :  { %141 = vst [vmem:[%s205_s3 + $0x8] sm:$0xff] %v138_v40  }

// kernel: discriminator_forward.9
= control target key start
LH: loop header
LB: loop body
LE: loop exit
PB: predicated region body
PF: predicated region fallthrough
CT: control target
= control target key end

     0   :  { %v521_v1 = vmov 0   ;;  %v88_v24 = vlaneseq  ;;  %v522_v25 = vmov 1966171168   ;;  %s648_s0 = inlined_call_operand.vmem [shape: bf16[512,128], index: 0, kind: input, shape index: {}]   ;;  %s649_s2 = inlined_call_operand.<no memory space> [shape: f32[1,1], index: 2, kind: input, shape index: {}]   ;;  %s650_s1 = inlined_call_operand.vmem [shape: bf16[1,512], index: 1, kind: input, shape index: {}]   ;;  %s651_s3 = inlined_call_operand.vmem [shape: f32[1,128], index: 3, kind: output, shape index: {}]  }
   0x1   :  { %v485_v0 = vld [vmem:[%s648_s0 + $0x40] sm:$0xff]   ;;  %484 = vset.pattern.permute.xlu0 %v521_v1  ;;  %v8_v2 = vstv %s649_s2  ;;  %v489_v6 = vld [vmem:[%s648_s0 + $0x48] sm:$0xff]   ;;  %v493_v10 = vld [vmem:[%s648_s0 + $0x50] sm:$0xff]   ;;  %v102_v26 = vunpack.c.l.s4 %v522_v25 }
   0x2   :  { %v486_v3 = vld [vmem:[%s648_s0 + $0xc0] sm:$0xff]   ;;  %9 = vst [vmem:[#allocation2] sm:$0x1] %v8_v2  ;;  %438 = vmatprep.subr.bf16.mxu0 %v485_v0  ;;  %v490_v7 = vld [vmem:[%s648_s0 + $0xc8] sm:$0xff]   ;;  %v494_v11 = vld [vmem:[%s648_s0 + $0xd0] sm:$0xff]   ;;  %v89_v31 = vshrl.u32 %v88_v24, 7 }
   0x3   :  { %v487_v4 = vld [vmem:[%s648_s0] sm:$0xff]   ;;  %460 = vmatprep.subr.bf16.mxu1 %v486_v3  ;;  %v491_v8 = vld [vmem:[%s648_s0 + $0x8] sm:$0xff]   ;;  %v495_v12 = vld [vmem:[%s648_s0 + $0x10] sm:$0xff]   ;;  %v103_v32 = vunpack.c.0.s8 %v102_v26 }
   0x4   :  { %v488_v5 = vld [vmem:[%s648_s0 + $0x80] sm:$0xff]   ;;  %439 = vmatpush3.bf16.msra.mxu0 %v487_v4  ;;  %v492_v9 = vld [vmem:[%s648_s0 + $0x88] sm:$0xff]   ;;  %v496_v13 = vld [vmem:[%s648_s0 + $0x90] sm:$0xff]   ;;  %v90_v47 = vsub.s32 0, %v89_v31 }
   0x5   :  { %461 = vmatpush3.bf16.msra.mxu1 %v488_v5  ;;  %440 = vmatprep.subr.bf16.mxu0 %v489_v6  ;;  %v497_v14 = vld [vmem:[%s648_s0 + $0x58] sm:$0xff]   ;;  %v501_v18 = vld [vmem:[%s648_s0 + $0x60] sm:$0xff]   ;;  %v505_v22 = vld [vmem:[%s648_s0 + $0x68] sm:$0xff]   ;;  %v106_v37 = vsub.s32 %v103_v32, %v89_v31 }
   0x6   :  { %462 = vmatprep.subr.bf16.mxu1 %v490_v7  ;;  %v498_v15 = vld [vmem:[%s648_s0 + $0xd8] sm:$0xff]   ;;  %v502_v19 = vld [vmem:[%s648_s0 + $0xe0] sm:$0xff]   ;;  %v506_v23 = vld [vmem:[%s648_s0 + $0xe8] sm:$0xff]  }
   0x7   :  { %v499_v16 = vld [vmem:[%s648_s0 + $0x18] sm:$0xff]   ;;  %v503_v20 = vld [vmem:[%s648_s0 + $0x20] sm:$0xff]   ;;  %v507_v27 = vld [vmem:[%s648_s0 + $0x28] sm:$0xff]  }
   0x8   :  { %441 = vmatpush3.bf16.msra.mxu0 %v491_v8  ;;  %v500_v17 = vld [vmem:[%s648_s0 + $0x98] sm:$0xff]   ;;  %v504_v21 = vld [vmem:[%s648_s0 + $0xa0] sm:$0xff]   ;;  %v508_v28 = vld [vmem:[%s648_s0 + $0xa8] sm:$0xff]  }
   0x9   :  { %463 = vmatpush3.bf16.msra.mxu1 %v492_v9  ;;  %442 = vmatprep.subr.bf16.mxu0 %v493_v10  ;;  %v509_v29 = vld [vmem:[%s648_s0 + $0x70] sm:$0xff]   ;;  %v513_v35 = vld [vmem:[%s648_s0 + $0x78] sm:$0xff]   ;;  %v404_v40 = vld.sshfl [vmem:[%s650_s1] sm:$0x33 pattern:$0x75316420] }
   0xa   :  { %464 = vmatprep.subr.bf16.mxu1 %v494_v11  ;;  %v510_v30 = vld [vmem:[%s648_s0 + $0xf0] sm:$0xff]   ;;  %v514_v36 = vld [vmem:[%s648_s0 + $0xf8] sm:$0xff]   ;;  %v82_v41 = vld [vmem:[#allocation2] sm:$0x1]  ;;  %v100_v42 = vcombine.high %v404_v40, %v404_v40  ;;  %v107_v43 = vrot.slane %v404_v40, %v106_v37 }
   0xb   :  { %v511_v33 = vld [vmem:[%s648_s0 + $0x30] sm:$0xff]   ;;  %v515_v38 = vld [vmem:[%s648_s0 + $0x38] sm:$0xff]   ;;  %85 = vperm.xlu0 %484, %v82_v41  }
   0xc   :  { %443 = vmatpush3.bf16.msra.mxu0 %v495_v12  ;;  %v512_v34 = vld [vmem:[%s648_s0 + $0xb0] sm:$0xff]   ;;  %v516_v39 = vld [vmem:[%s648_s0 + $0xb8] sm:$0xff]   ;;  %v114_v44 = vrot.slane %v100_v42, %v106_v37  ;;  %v115_v45 = vcombine.high %v107_v43, %v107_v43 }
   0xd   :  { %465 = vmatpush3.bf16.msra.mxu1 %v496_v13  ;;  %444 = vmatprep.subr.bf16.mxu0 %v497_v14 }
   0xe   :  { %466 = vmatprep.subr.bf16.mxu1 %v498_v15  ;;  %345 = vmatprep.mubr.bf16.mxu0 %v114_v44  ;;  %v116_v46 = vcombine.high %v114_v44, %v114_v44 }
  0x10   :  { %445 = vmatpush3.bf16.msra.mxu0 %v499_v16  ;;  %385 = vmatprep.mubr.bf16.mxu1 %v116_v46 }
  0x11   :  { %467 = vmatpush3.bf16.msra.mxu1 %v500_v17  ;;  %446 = vmatprep.subr.bf16.mxu0 %v501_v18 }
  0x12   :  { %468 = vmatprep.subr.bf16.mxu1 %v502_v19 }
  0x14   :  { %447 = vmatpush3.bf16.msra.mxu0 %v503_v20 }
  0x15   :  { %469 = vmatpush3.bf16.msra.mxu1 %v504_v21  ;;  %448 = vmatprep.subr.bf16.mxu0 %v505_v22 }
  0x16   :  { %470 = vmatprep.subr.bf16.mxu1 %v506_v23 }
  0x18   :  { %449 = vmatpush3.bf16.msra.mxu0 %v507_v27 }
  0x19   :  { %471 = vmatpush3.bf16.msra.mxu1 %v508_v28  ;;  %450 = vmatprep.subr.bf16.mxu0 %v509_v29 }
  0x1a   :  { %472 = vmatprep.subr.bf16.mxu1 %v510_v30 }
  0x1c   :  { %451 = vmatpush3.bf16.msra.mxu0 %v511_v33 }
  0x1d   :  { %473 = vmatpush3.bf16.msra.mxu1 %v512_v34  ;;  %452 = vmatprep.subr.bf16.mxu0 %v513_v35 }
  0x1e   :  { %474 = vmatprep.subr.bf16.mxu1 %v514_v36 }
  0x20   :  { %453 = vmatpush3.bf16.msra.mxu0 %v515_v38 }
  0x21   :  { %475 = vmatpush3.bf16.msra.mxu1 %v516_v39 }
  0x23   :  { %346 = vmatmul.mubr.bf16.vlgmr.msra.gmra.mrb[0].mxu0 %v107_v43 }
  0x24   :  { %386 = vmatmul.mubr.bf16.vlgmr.msra.gmra.mrb[0].mxu1 %v115_v45 }
  0x8a   :  { %v86_v48 = vpop.permute.xlu0 %85 }
  0x8b   :  { %v91_v50 = vrot.slane %v86_v48, %v90_v47 }
  0xf6   :  { %v454_v49 = vpop.f32.mrb[0].mxu0 }
  0xf7   :  { %v455_v51 = vpop.f32.mrb[1].mxu0  ;;  %v476_v52 = vpop.f32.mrb[0].mxu1 }
  0xf8   :  { %v456_v53 = vadd.f32 %v455_v51, %v454_v49  ;;  %v457_v54 = vpop.f32.mrb[2].mxu0  ;;  %v477_v55 = vpop.f32.mrb[1].mxu1 }
  0xf9   :  { %v458_v56 = vpop.f32.mrb[3].mxu0  ;;  %v478_v58 = vadd.f32 %v477_v55, %v476_v52  ;;  %v479_v59 = vpop.f32.mrb[2].mxu1 }
  0xfa   :  { %v348_v57 = vadd.f32 %v456_v53, %v91_v50  ;;  %v480_v60 = vpop.f32.mrb[3].mxu1 }
  0xfc   :  { %v388_v61 = vadd.f32 %v478_v58, %v348_v57 }
  0xfe   :  { %v437_v62 = vmul.f32 -1.442695, %v388_v61 }
 0x100   :  { %517 = vpow2.f32 %v437_v62 }
 0x10a   :  { %v518_v63 = vpop.eup %517 }
 0x10b   :  { %v396_v0 = vadd.f32 1.0, %v518_v63 }
 0x10d   :  { %519 = vrcp.f32 %v396_v0 }
 0x117   :  { %v520_v1 = vpop.eup %519 }
 0x118   :  { %399 = vst [vmem:[%s651_s3] sm:$0x1] %v520_v1 }

</bundles_post_ra>
